<compile_context>
chip_gen: v7x
topology: tpu7x:2x2x1
jax: 0.10.0
libtpu: 0.0.40
codegen_flags: <defaults>
</compile_context>

<pallas_src>
import functools

import jax
import jax.numpy as jnp
from jax.experimental import pallas as pl
from jax.experimental.pallas import tpu as pltpu


def _standardize(w, eps=1e-5):
    """Per-output-channel weight standardization (biased variance, eps=1e-5)."""
    mu = jnp.mean(w, axis=1, keepdims=True)
    var = jnp.mean((w - mu) ** 2, axis=1, keepdims=True)
    return (w - mu) * jax.lax.rsqrt(var + eps)


def _cond_block_kernel(x_ref, y_ref,
                       wq_ref, bq_ref, wk_ref, bk_ref,
                       wv_ref, bv_ref, wo_ref, bo_ref,
                       g_ref, bln_ref, mask_ref, o_ref,
                       *, inv_scale, ln_eps, bblk, matmul_dtype):
    # Weights arrive pre-standardized; head mask arrives precomputed (hoisted).
    wq = wq_ref[...]; wk = wk_ref[...]
    wv = wv_ref[...]; wo = wo_ref[...]
    neg_bias = mask_ref[...]                           # (E, E) block-diag additive mask

    E = wq.shape[0]
    L = x_ref.shape[2]
    Lc = y_ref.shape[2]

    # Hoisted broadcasts (JAX does not CSE broadcast_in_dim inside the loop).
    bq_b = jnp.broadcast_to(bq_ref[...], (E, Lc))
    bk_b = jnp.broadcast_to(bk_ref[...], (E, Lc))
    bv_b = jnp.broadcast_to(bv_ref[...], (E, L))
    bo_b = jnp.broadcast_to(bo_ref[...], (E, L))
    g_b = jnp.broadcast_to(g_ref[...], (E, L))
    bln_b = jnp.broadcast_to(bln_ref[...], (E, L))

    def cast(a):
        return a if matmul_dtype is None else a.astype(matmul_dtype)

    def mdot(a, b):
        return jnp.dot(cast(a), cast(b), preferred_element_type=jnp.float32)

    # Static unroll over the batch block: every op stays 2-D and sublane-aligned.
    for b in range(bblk):
        x = x_ref[b]                                   # (E, L)
        y = y_ref[b]                                   # (C, Lc)

        # 1x1 convs == channel matmuls (MXU)
        q = mdot(wq, y) + bq_b                         # (E, Lc)
        k = mdot(wk, y) + bk_b                         # (E, Lc)
        v = mdot(wv, x) + bv_b                         # (E, L)

        # Single (E,Lc)x(Lc,E) score matmul; the block-diagonal mask keeps the
        # per-head attention semantics without 8 tiny misaligned matmuls.
        s = jax.lax.dot_general(cast(q), cast(k), (((1,), (1,)), ((), ())),
                                preferred_element_type=jnp.float32)   # (E, E)
        s = s * inv_scale + neg_bias

        # Numerically-exact softmax (no approximate reciprocal).
        s = s - jnp.max(s, axis=-1, keepdims=True)
        p = jnp.exp(s)
        p = p / jnp.sum(p, axis=-1, keepdims=True)

        attn = mdot(p, v)                              # (E, L)

        # out_proj + residual
        pre = mdot(wo, attn) + bo_b + x                # (E, L)

        # LayerNorm over the channel (embed) axis
        mu = jnp.mean(pre, axis=0, keepdims=True)      # (1, L)
        var = jnp.mean((pre - mu) ** 2, axis=0, keepdims=True)
        normed = (pre - mu) * jax.lax.rsqrt(var + ln_eps)
        o_ref[b] = normed * g_b + bln_b                # mask=None path -> * 1


def conditional_block2(x, y, params, *, num_heads=8, batch_block=None,
                       matmul_dtype=None):
    """x: (B, E, L), y: (B, C, Lc). Returns (B, E, L)."""
    B, E, L = x.shape
    _, C, Lc = y.shape
    assert E % num_heads == 0, "embed_dim must be divisible by num_heads"

    if batch_block is None:
        # Amortize per-grid-step overhead while keeping >= 2 parallel grid
        # steps so both v7x TensorCores get work.
        batch_block = max(1, B // 2) if B % 2 == 0 else 1
    assert B % batch_block == 0

    # NOTE: reproduces torch precedence: embed_dim // num_heads ** 0.5
    scale = float(E // (num_heads ** 0.5))
    inv_scale = 1.0 / scale

    wq, bq, wk, bk, wv, bv, wo, bo, gamma, beta = params

    # Grid-invariant work hoisted out of the kernel (done once by XLA):
    wq_s = _standardize(wq)
    wk_s = _standardize(wk)
    wv_s = _standardize(wv)
    wo_s = _standardize(wo)

    dh = E // num_heads
    row = jnp.arange(E, dtype=jnp.int32)[:, None] // dh
    col = jnp.arange(E, dtype=jnp.int32)[None, :] // dh
    neg_bias = jnp.where(row == col, 0.0, -1e30).astype(jnp.float32)    # (E, E)

    kernel = functools.partial(
        _cond_block_kernel,
        inv_scale=inv_scale, ln_eps=1e-5,
        bblk=batch_block, matmul_dtype=matmul_dtype,
    )

    full2 = lambda shp: pl.BlockSpec(shp, lambda b: (0, 0))

    return pl.pallas_call(
        kernel,
        out_shape=jax.ShapeDtypeStruct((B, E, L), jnp.float32),
        grid=(B // batch_block,),
        in_specs=[
            pl.BlockSpec((batch_block, E, L), lambda b: (b, 0, 0)),    # x
            pl.BlockSpec((batch_block, C, Lc), lambda b: (b, 0, 0)),   # y
            full2((E, C)), full2((E, 1)),                              # q_proj (std)
            full2((E, C)), full2((E, 1)),                              # k_proj (std)
            full2((E, E)), full2((E, 1)),                              # v_proj (std)
            full2((E, E)), full2((E, 1)),                              # out_proj (std)
            full2((E, 1)), full2((E, 1)),                              # LN gamma/beta
            full2((E, E)),                                             # head mask
        ],
        out_specs=pl.BlockSpec((batch_block, E, L), lambda b: (b, 0, 0)),
        compiler_params=pltpu.CompilerParams(
            dimension_semantics=("parallel",)),
    )(x, y, wq_s, bq, wk_s, bk, wv_s, bv, wo_s, bo, gamma, beta, neg_bias)


def _reference(x, y, params, *, num_heads=8, precision=None):
    """Pure-JAX reference mirroring the PyTorch forward (mask=None path)."""
    B, E, L = x.shape
    wq, bq, wk, bk, wv, bv, wo, bo, gamma, beta = params
    scale = float(E // (num_heads ** 0.5))

    q = jnp.einsum('ec,bcl->bel', _standardize(wq), y, precision=precision) + bq[None]
    k = jnp.einsum('ec,bcl->bel', _standardize(wk), y, precision=precision) + bk[None]
    v = jnp.einsum('ef,bfl->bel', _standardize(wv), x, precision=precision) + bv[None]

    dh = E // num_heads
    qh = q.reshape(B, num_heads, dh, -1)
    kh = k.reshape(B, num_heads, dh, -1)
    vh = v.reshape(B, num_heads, dh, -1)

    s = jnp.einsum('bhdl,bhel->bhde', qh, kh, precision=precision) / scale
    s = s - jnp.max(s, axis=-1, keepdims=True)
    p = jnp.exp(s)
    p = p / jnp.sum(p, axis=-1, keepdims=True)

    out = jnp.einsum('bhde,bhel->bhdl', p, vh, precision=precision).reshape(B, E, -1)

    pre = jnp.einsum('ef,bfl->bel', _standardize(wo), out, precision=precision) + bo[None] + x
    mu = pre.mean(axis=1, keepdims=True)
    var = ((pre - mu) ** 2).mean(axis=1, keepdims=True)
    normed = (pre - mu) * jax.lax.rsqrt(var + 1e-5)
    return normed * gamma[None] + beta[None]


if __name__ == "__main__":
    B, cond_dim, embed_dim = 4, 16, 32
    L, Lc = 16, 8
    num_heads = 8

    key = jax.random.PRNGKey(0)
    ks = jax.random.split(key, 10)

    x = jax.random.normal(ks[0], (B, embed_dim, L), jnp.float32)
    y = jax.random.normal(ks[1], (B, cond_dim, Lc), jnp.float32)

    # Deterministic parameter init (conv1d kernel_size=1 -> squeeze kernel dim).
    def conv_params(kw, kb, out_c, in_c):
        bound = 1.0 / jnp.sqrt(in_c)
        w = jax.random.uniform(kw, (out_c, in_c), jnp.float32, -bound, bound)
        b = jax.random.uniform(kb, (out_c, 1), jnp.float32, -bound, bound)
        return w, b

    wq, bq = conv_params(ks[2], ks[3], embed_dim, cond_dim)
    wk, bk = conv_params(ks[4], ks[5], embed_dim, cond_dim)
    wv, bv = conv_params(ks[6], ks[7], embed_dim, embed_dim)
    wo, bo = conv_params(ks[8], ks[9], embed_dim, embed_dim)
    gamma = jnp.ones((embed_dim, 1), jnp.float32)     # LayerNorm default init
    beta = jnp.zeros((embed_dim, 1), jnp.float32)

    params = (wq, bq, wk, bk, wv, bv, wo, bo, gamma, beta)

    run = jax.jit(functools.partial(conditional_block2, num_heads=num_heads))
    out = jax.block_until_ready(run(x, y, params))
    assert out.shape == (B, embed_dim, L)
    assert bool(jnp.all(jnp.isfinite(out)))

    # The kernel's matmul precision depends on the execution path: Mosaic-compiled
    # f32 matmuls are ~full f32, while interpret-mode emulation uses the backend's
    # default matmul precision (bf16 passes on TPU).  Accept agreement with the
    # matching-precision pure-JAX reference; both must be tight to pass.
    ref_hi = _reference(x, y, params, num_heads=num_heads,
                        precision=jax.lax.Precision.HIGHEST)
    ref_lo = _reference(x, y, params, num_heads=num_heads, precision=None)
    err_hi = float(jnp.max(jnp.abs(out - ref_hi)))
    err_lo = float(jnp.max(jnp.abs(out - ref_lo)))
    assert min(err_hi, err_lo) < 5e-3, (
        f"max abs err: vs f32 ref {err_hi:.3e}, vs default-precision ref {err_lo:.3e}")

    print("KERNEL_OK")
</pallas_src>

<mosaic_0001>
module attributes {stable_mosaic.version = 11 : i64} {
  func.func @_cond_block_kernel(%arg0: i32, %arg1: memref<2x32x16xf32, #tpu.memory_space<vmem>>, %arg2: memref<2x16x8xf32, #tpu.memory_space<vmem>>, %arg3: memref<32x16xf32, #tpu.memory_space<vmem>>, %arg4: memref<32x1xf32, #tpu.memory_space<vmem>>, %arg5: memref<32x16xf32, #tpu.memory_space<vmem>>, %arg6: memref<32x1xf32, #tpu.memory_space<vmem>>, %arg7: memref<32x32xf32, #tpu.memory_space<vmem>>, %arg8: memref<32x1xf32, #tpu.memory_space<vmem>>, %arg9: memref<32x32xf32, #tpu.memory_space<vmem>>, %arg10: memref<32x1xf32, #tpu.memory_space<vmem>>, %arg11: memref<32x1xf32, #tpu.memory_space<vmem>>, %arg12: memref<32x1xf32, #tpu.memory_space<vmem>>, %arg13: memref<32x32xf32, #tpu.memory_space<vmem>>, %arg14: memref<2x32x16xf32, #tpu.memory_space<vmem>>) attributes {dimension_semantics = [#tpu.dimension_semantics<parallel>], iteration_bounds = array<i64: 2>, scalar_prefetch = 0 : i64, scratch_operands = 0 : i64, tpu.core_type = #tpu.core_type<tc>, window_params = [{transform_indices = @transform_0, window_bounds = array<i64: 2, 32, 16>}, {transform_indices = @transform_1, window_bounds = array<i64: 2, 16, 8>}, {pipeline_mode = #tpu.pipeline_mode<synchronous>, transform_indices = @transform_2, window_bounds = array<i64: 32, 16>}, {pipeline_mode = #tpu.pipeline_mode<synchronous>, transform_indices = @transform_3, window_bounds = array<i64: 32, 1>}, {pipeline_mode = #tpu.pipeline_mode<synchronous>, transform_indices = @transform_4, window_bounds = array<i64: 32, 16>}, {pipeline_mode = #tpu.pipeline_mode<synchronous>, transform_indices = @transform_5, window_bounds = array<i64: 32, 1>}, {pipeline_mode = #tpu.pipeline_mode<synchronous>, transform_indices = @transform_6, window_bounds = array<i64: 32, 32>}, {pipeline_mode = #tpu.pipeline_mode<synchronous>, transform_indices = @transform_7, window_bounds = array<i64: 32, 1>}, {pipeline_mode = #tpu.pipeline_mode<synchronous>, transform_indices = @transform_8, window_bounds = array<i64: 32, 32>}, {pipeline_mode = #tpu.pipeline_mode<synchronous>, transform_indices = @transform_9, window_bounds = array<i64: 32, 1>}, {pipeline_mode = #tpu.pipeline_mode<synchronous>, transform_indices = @transform_10, window_bounds = array<i64: 32, 1>}, {pipeline_mode = #tpu.pipeline_mode<synchronous>, transform_indices = @transform_11, window_bounds = array<i64: 32, 1>}, {pipeline_mode = #tpu.pipeline_mode<synchronous>, transform_indices = @transform_12, window_bounds = array<i64: 32, 32>}, {transform_indices = @transform_13, window_bounds = array<i64: 2, 32, 16>}]} {
    %c0 = arith.constant 0 : index
    %c0_0 = arith.constant 0 : index
    %0 = vector.load %arg3[%c0, %c0_0] : memref<32x16xf32, #tpu.memory_space<vmem>>, vector<32x16xf32>
    %c0_1 = arith.constant 0 : index
    %c0_2 = arith.constant 0 : index
    %1 = vector.load %arg5[%c0_1, %c0_2] : memref<32x16xf32, #tpu.memory_space<vmem>>, vector<32x16xf32>
    %c0_3 = arith.constant 0 : index
    %c0_4 = arith.constant 0 : index
    %2 = vector.load %arg7[%c0_3, %c0_4] : memref<32x32xf32, #tpu.memory_space<vmem>>, vector<32x32xf32>
    %c0_5 = arith.constant 0 : index
    %c0_6 = arith.constant 0 : index
    %3 = vector.load %arg9[%c0_5, %c0_6] : memref<32x32xf32, #tpu.memory_space<vmem>>, vector<32x32xf32>
    %c0_7 = arith.constant 0 : index
    %c0_8 = arith.constant 0 : index
    %4 = vector.load %arg13[%c0_7, %c0_8] : memref<32x32xf32, #tpu.memory_space<vmem>>, vector<32x32xf32>
    %c0_9 = arith.constant 0 : index
    %c0_10 = arith.constant 0 : index
    %5 = vector.load %arg4[%c0_9, %c0_10] : memref<32x1xf32, #tpu.memory_space<vmem>>, vector<32x1xf32>
    %6 = vector.shape_cast %5 : vector<32x1xf32> to vector<32x1xf32>
    %7 = vector.broadcast %6 : vector<32x1xf32> to vector<32x8xf32>
    %c0_11 = arith.constant 0 : index
    %c0_12 = arith.constant 0 : index
    %8 = vector.load %arg6[%c0_11, %c0_12] : memref<32x1xf32, #tpu.memory_space<vmem>>, vector<32x1xf32>
    %9 = vector.shape_cast %8 : vector<32x1xf32> to vector<32x1xf32>
    %10 = vector.broadcast %9 : vector<32x1xf32> to vector<32x8xf32>
    %c0_13 = arith.constant 0 : index
    %c0_14 = arith.constant 0 : index
    %11 = vector.load %arg8[%c0_13, %c0_14] : memref<32x1xf32, #tpu.memory_space<vmem>>, vector<32x1xf32>
    %12 = vector.shape_cast %11 : vector<32x1xf32> to vector<32x1xf32>
    %13 = vector.broadcast %12 : vector<32x1xf32> to vector<32x16xf32>
    %c0_15 = arith.constant 0 : index
    %c0_16 = arith.constant 0 : index
    %14 = vector.load %arg10[%c0_15, %c0_16] : memref<32x1xf32, #tpu.memory_space<vmem>>, vector<32x1xf32>
    %15 = vector.shape_cast %14 : vector<32x1xf32> to vector<32x1xf32>
    %16 = vector.broadcast %15 : vector<32x1xf32> to vector<32x16xf32>
    %c0_17 = arith.constant 0 : index
    %c0_18 = arith.constant 0 : index
    %17 = vector.load %arg11[%c0_17, %c0_18] : memref<32x1xf32, #tpu.memory_space<vmem>>, vector<32x1xf32>
    %18 = vector.shape_cast %17 : vector<32x1xf32> to vector<32x1xf32>
    %19 = vector.broadcast %18 : vector<32x1xf32> to vector<32x16xf32>
    %c0_19 = arith.constant 0 : index
    %c0_20 = arith.constant 0 : index
    %20 = vector.load %arg12[%c0_19, %c0_20] : memref<32x1xf32, #tpu.memory_space<vmem>>, vector<32x1xf32>
    %21 = vector.shape_cast %20 : vector<32x1xf32> to vector<32x1xf32>
    %22 = vector.broadcast %21 : vector<32x1xf32> to vector<32x16xf32>
    %c0_21 = arith.constant 0 : index
    %c0_22 = arith.constant 0 : index
    %c0_23 = arith.constant 0 : index
    %23 = vector.load %arg1[%c0_21, %c0_22, %c0_23] : memref<2x32x16xf32, #tpu.memory_space<vmem>>, vector<1x32x16xf32>
    %24 = vector.shape_cast %23 : vector<1x32x16xf32> to vector<32x16xf32>
    %c0_24 = arith.constant 0 : index
    %c0_25 = arith.constant 0 : index
    %c0_26 = arith.constant 0 : index
    %25 = vector.load %arg2[%c0_24, %c0_25, %c0_26] : memref<2x16x8xf32, #tpu.memory_space<vmem>>, vector<1x16x8xf32>
    %26 = vector.shape_cast %25 : vector<1x16x8xf32> to vector<16x8xf32>
    %cst = arith.constant dense<0.000000e+00> : vector<32x8xf32>
    %27 = tpu.matmul %0, %26, %cst {dimension_numbers = #tpu.dot_dimension_numbers<[1], [0], [0], [1], [0, 0, 1, 1], [], []>} : vector<32x16xf32>, vector<16x8xf32>, vector<32x8xf32> -> vector<32x8xf32>
    %28 = arith.addf %27, %7 : vector<32x8xf32>
    %cst_27 = arith.constant dense<0.000000e+00> : vector<32x8xf32>
    %29 = tpu.matmul %1, %26, %cst_27 {dimension_numbers = #tpu.dot_dimension_numbers<[1], [0], [0], [1], [0, 0, 1, 1], [], []>} : vector<32x16xf32>, vector<16x8xf32>, vector<32x8xf32> -> vector<32x8xf32>
    %30 = arith.addf %29, %10 : vector<32x8xf32>
    %cst_28 = arith.constant dense<0.000000e+00> : vector<32x16xf32>
    %31 = tpu.matmul %2, %24, %cst_28 {dimension_numbers = #tpu.dot_dimension_numbers<[1], [0], [0], [1], [0, 0, 1, 1], [], []>} : vector<32x32xf32>, vector<32x16xf32>, vector<32x16xf32> -> vector<32x16xf32>
    %32 = arith.addf %31, %13 : vector<32x16xf32>
    %cst_29 = arith.constant dense<0.000000e+00> : vector<32x32xf32>
    %33 = tpu.matmul %28, %30, %cst_29 {dimension_numbers = #tpu.dot_dimension_numbers<[1], [1], [0], [0], [0, 0, 1, 0], [], []>} : vector<32x8xf32>, vector<32x8xf32>, vector<32x32xf32> -> vector<32x32xf32>
    %cst_30 = arith.constant 0.0909090936 : f32
    %34 = vector.broadcast %cst_30 : f32 to vector<32x32xf32>
    %35 = arith.mulf %33, %34 : vector<32x32xf32>
    %36 = arith.addf %35, %4 : vector<32x32xf32>
    %cst_31 = arith.constant dense<0xFF800000> : vector<32xf32>
    %37 = vector.multi_reduction <maximumf>, %36, %cst_31 [1] : vector<32x32xf32> to vector<32xf32>
    %38 = vector.shape_cast %37 : vector<32xf32> to vector<32x1xf32>
    %39 = vector.broadcast %38 : vector<32x1xf32> to vector<32x32xf32>
    %40 = arith.subf %36, %39 : vector<32x32xf32>
    %41 = math.exp %40 : vector<32x32xf32>
    %cst_32 = arith.constant dense<0.000000e+00> : vector<32xf32>
    %42 = vector.multi_reduction <add>, %41, %cst_32 [1] : vector<32x32xf32> to vector<32xf32>
    %43 = vector.shape_cast %42 : vector<32xf32> to vector<32x1xf32>
    %44 = vector.broadcast %43 : vector<32x1xf32> to vector<32x32xf32>
    %45 = arith.divf %41, %44 : vector<32x32xf32>
    %cst_33 = arith.constant dense<0.000000e+00> : vector<32x16xf32>
    %46 = tpu.matmul %45, %32, %cst_33 {dimension_numbers = #tpu.dot_dimension_numbers<[1], [0], [0], [1], [0, 0, 1, 1], [], []>} : vector<32x32xf32>, vector<32x16xf32>, vector<32x16xf32> -> vector<32x16xf32>
    %cst_34 = arith.constant dense<0.000000e+00> : vector<32x16xf32>
    %47 = tpu.matmul %3, %46, %cst_34 {dimension_numbers = #tpu.dot_dimension_numbers<[1], [0], [0], [1], [0, 0, 1, 1], [], []>} : vector<32x32xf32>, vector<32x16xf32>, vector<32x16xf32> -> vector<32x16xf32>
    %48 = arith.addf %47, %16 : vector<32x16xf32>
    %49 = arith.addf %48, %24 : vector<32x16xf32>
    %cst_35 = arith.constant dense<0.000000e+00> : vector<16xf32>
    %50 = vector.multi_reduction <add>, %49, %cst_35 [0] : vector<32x16xf32> to vector<16xf32>
    %51 = vector.shape_cast %50 : vector<16xf32> to vector<1x16xf32>
    %cst_36 = arith.constant 3.200000e+01 : f32
    %52 = vector.broadcast %cst_36 : f32 to vector<1x16xf32>
    %53 = arith.divf %51, %52 : vector<1x16xf32>
    %54 = vector.broadcast %53 : vector<1x16xf32> to vector<32x16xf32>
    %55 = arith.subf %49, %54 : vector<32x16xf32>
    %56 = arith.mulf %55, %55 : vector<32x16xf32>
    %cst_37 = arith.constant dense<0.000000e+00> : vector<16xf32>
    %57 = vector.multi_reduction <add>, %56, %cst_37 [0] : vector<32x16xf32> to vector<16xf32>
    %58 = vector.shape_cast %57 : vector<16xf32> to vector<1x16xf32>
    %cst_38 = arith.constant 3.200000e+01 : f32
    %59 = vector.broadcast %cst_38 : f32 to vector<1x16xf32>
    %60 = arith.divf %58, %59 : vector<1x16xf32>
    %61 = vector.broadcast %53 : vector<1x16xf32> to vector<32x16xf32>
    %62 = arith.subf %49, %61 : vector<32x16xf32>
    %cst_39 = arith.constant 9.99999974E-6 : f32
    %63 = vector.broadcast %cst_39 : f32 to vector<1x16xf32>
    %64 = arith.addf %60, %63 : vector<1x16xf32>
    %65 = math.rsqrt %64 : vector<1x16xf32>
    %66 = vector.broadcast %65 : vector<1x16xf32> to vector<32x16xf32>
    %67 = arith.mulf %62, %66 : vector<32x16xf32>
    %68 = arith.mulf %67, %19 : vector<32x16xf32>
    %69 = arith.addf %68, %22 : vector<32x16xf32>
    %c0_40 = arith.constant 0 : index
    %c0_41 = arith.constant 0 : index
    %c0_42 = arith.constant 0 : index
    %70 = vector.load %arg14[%c0_40, %c0_41, %c0_42] : memref<2x32x16xf32, #tpu.memory_space<vmem>>, vector<1x32x16xf32>
    %71 = vector.shape_cast %70 : vector<1x32x16xf32> to vector<32x16xf32>
    %72 = vector.shape_cast %69 : vector<32x16xf32> to vector<1x32x16xf32>
    tpu.vector_store %arg14[%c0_40, %c0_41, %c0_42], %72 {strides = array<i32>} : memref<2x32x16xf32, #tpu.memory_space<vmem>>, vector<1x32x16xf32>,
    %c1 = arith.constant 1 : index
    %c0_43 = arith.constant 0 : index
    %c0_44 = arith.constant 0 : index
    %73 = vector.load %arg1[%c1, %c0_43, %c0_44] : memref<2x32x16xf32, #tpu.memory_space<vmem>>, vector<1x32x16xf32>
    %74 = vector.shape_cast %73 : vector<1x32x16xf32> to vector<32x16xf32>
    %c1_45 = arith.constant 1 : index
    %c0_46 = arith.constant 0 : index
    %c0_47 = arith.constant 0 : index
    %75 = vector.load %arg2[%c1_45, %c0_46, %c0_47] : memref<2x16x8xf32, #tpu.memory_space<vmem>>, vector<1x16x8xf32>
    %76 = vector.shape_cast %75 : vector<1x16x8xf32> to vector<16x8xf32>
    %cst_48 = arith.constant dense<0.000000e+00> : vector<32x8xf32>
    %77 = tpu.matmul %0, %76, %cst_48 {dimension_numbers = #tpu.dot_dimension_numbers<[1], [0], [0], [1], [0, 0, 1, 1], [], []>} : vector<32x16xf32>, vector<16x8xf32>, vector<32x8xf32> -> vector<32x8xf32>
    %78 = arith.addf %77, %7 : vector<32x8xf32>
    %cst_49 = arith.constant dense<0.000000e+00> : vector<32x8xf32>
    %79 = tpu.matmul %1, %76, %cst_49 {dimension_numbers = #tpu.dot_dimension_numbers<[1], [0], [0], [1], [0, 0, 1, 1], [], []>} : vector<32x16xf32>, vector<16x8xf32>, vector<32x8xf32> -> vector<32x8xf32>
    %80 = arith.addf %79, %10 : vector<32x8xf32>
    %cst_50 = arith.constant dense<0.000000e+00> : vector<32x16xf32>
    %81 = tpu.matmul %2, %74, %cst_50 {dimension_numbers = #tpu.dot_dimension_numbers<[1], [0], [0], [1], [0, 0, 1, 1], [], []>} : vector<32x32xf32>, vector<32x16xf32>, vector<32x16xf32> -> vector<32x16xf32>
    %82 = arith.addf %81, %13 : vector<32x16xf32>
    %cst_51 = arith.constant dense<0.000000e+00> : vector<32x32xf32>
    %83 = tpu.matmul %78, %80, %cst_51 {dimension_numbers = #tpu.dot_dimension_numbers<[1], [1], [0], [0], [0, 0, 1, 0], [], []>} : vector<32x8xf32>, vector<32x8xf32>, vector<32x32xf32> -> vector<32x32xf32>
    %cst_52 = arith.constant 0.0909090936 : f32
    %84 = vector.broadcast %cst_52 : f32 to vector<32x32xf32>
    %85 = arith.mulf %83, %84 : vector<32x32xf32>
    %86 = arith.addf %85, %4 : vector<32x32xf32>
    %cst_53 = arith.constant dense<0xFF800000> : vector<32xf32>
    %87 = vector.multi_reduction <maximumf>, %86, %cst_53 [1] : vector<32x32xf32> to vector<32xf32>
    %88 = vector.shape_cast %87 : vector<32xf32> to vector<32x1xf32>
    %89 = vector.broadcast %88 : vector<32x1xf32> to vector<32x32xf32>
    %90 = arith.subf %86, %89 : vector<32x32xf32>
    %91 = math.exp %90 : vector<32x32xf32>
    %cst_54 = arith.constant dense<0.000000e+00> : vector<32xf32>
    %92 = vector.multi_reduction <add>, %91, %cst_54 [1] : vector<32x32xf32> to vector<32xf32>
    %93 = vector.shape_cast %92 : vector<32xf32> to vector<32x1xf32>
    %94 = vector.broadcast %93 : vector<32x1xf32> to vector<32x32xf32>
    %95 = arith.divf %91, %94 : vector<32x32xf32>
    %cst_55 = arith.constant dense<0.000000e+00> : vector<32x16xf32>
    %96 = tpu.matmul %95, %82, %cst_55 {dimension_numbers = #tpu.dot_dimension_numbers<[1], [0], [0], [1], [0, 0, 1, 1], [], []>} : vector<32x32xf32>, vector<32x16xf32>, vector<32x16xf32> -> vector<32x16xf32>
    %cst_56 = arith.constant dense<0.000000e+00> : vector<32x16xf32>
    %97 = tpu.matmul %3, %96, %cst_56 {dimension_numbers = #tpu.dot_dimension_numbers<[1], [0], [0], [1], [0, 0, 1, 1], [], []>} : vector<32x32xf32>, vector<32x16xf32>, vector<32x16xf32> -> vector<32x16xf32>
    %98 = arith.addf %97, %16 : vector<32x16xf32>
    %99 = arith.addf %98, %74 : vector<32x16xf32>
    %cst_57 = arith.constant dense<0.000000e+00> : vector<16xf32>
    %100 = vector.multi_reduction <add>, %99, %cst_57 [0] : vector<32x16xf32> to vector<16xf32>
    %101 = vector.shape_cast %100 : vector<16xf32> to vector<1x16xf32>
    %cst_58 = arith.constant 3.200000e+01 : f32
    %102 = vector.broadcast %cst_58 : f32 to vector<1x16xf32>
    %103 = arith.divf %101, %102 : vector<1x16xf32>
    %104 = vector.broadcast %103 : vector<1x16xf32> to vector<32x16xf32>
    %105 = arith.subf %99, %104 : vector<32x16xf32>
    %106 = arith.mulf %105, %105 : vector<32x16xf32>
    %cst_59 = arith.constant dense<0.000000e+00> : vector<16xf32>
    %107 = vector.multi_reduction <add>, %106, %cst_59 [0] : vector<32x16xf32> to vector<16xf32>
    %108 = vector.shape_cast %107 : vector<16xf32> to vector<1x16xf32>
    %cst_60 = arith.constant 3.200000e+01 : f32
    %109 = vector.broadcast %cst_60 : f32 to vector<1x16xf32>
    %110 = arith.divf %108, %109 : vector<1x16xf32>
    %111 = vector.broadcast %103 : vector<1x16xf32> to vector<32x16xf32>
    %112 = arith.subf %99, %111 : vector<32x16xf32>
    %cst_61 = arith.constant 9.99999974E-6 : f32
    %113 = vector.broadcast %cst_61 : f32 to vector<1x16xf32>
    %114 = arith.addf %110, %113 : vector<1x16xf32>
    %115 = math.rsqrt %114 : vector<1x16xf32>
    %116 = vector.broadcast %115 : vector<1x16xf32> to vector<32x16xf32>
    %117 = arith.mulf %112, %116 : vector<32x16xf32>
    %118 = arith.mulf %117, %19 : vector<32x16xf32>
    %119 = arith.addf %118, %22 : vector<32x16xf32>
    %c1_62 = arith.constant 1 : index
    %c0_63 = arith.constant 0 : index
    %c0_64 = arith.constant 0 : index
    %120 = vector.load %arg14[%c1_62, %c0_63, %c0_64] : memref<2x32x16xf32, #tpu.memory_space<vmem>>, vector<1x32x16xf32>
    %121 = vector.shape_cast %120 : vector<1x32x16xf32> to vector<32x16xf32>
    %122 = vector.shape_cast %119 : vector<32x16xf32> to vector<1x32x16xf32>
    tpu.vector_store %arg14[%c1_62, %c0_63, %c0_64], %122 {strides = array<i32>} : memref<2x32x16xf32, #tpu.memory_space<vmem>>, vector<1x32x16xf32>,
    return
  }
  func.func @transform_0(%arg0: i32) -> (i32, i32, i32) {
    %c0_i32 = arith.constant 0 : i32
    %c0_i32_0 = arith.constant 0 : i32
    %c0_i32_1 = arith.constant 0 : i32
    return %arg0, %c0_i32, %c0_i32_0 : i32, i32, i32
  }
  func.func @transform_1(%arg0: i32) -> (i32, i32, i32) {
    %c0_i32 = arith.constant 0 : i32
    %c0_i32_0 = arith.constant 0 : i32
    %c0_i32_1 = arith.constant 0 : i32
    return %arg0, %c0_i32, %c0_i32_0 : i32, i32, i32
  }
  func.func @transform_2(%arg0: i32) -> (i32, i32) {
    %c0_i32 = arith.constant 0 : i32
    %c0_i32_0 = arith.constant 0 : i32
    %c0_i32_1 = arith.constant 0 : i32
    return %c0_i32, %c0_i32_0 : i32, i32
  }
  func.func @transform_3(%arg0: i32) -> (i32, i32) {
    %c0_i32 = arith.constant 0 : i32
    %c0_i32_0 = arith.constant 0 : i32
    %c0_i32_1 = arith.constant 0 : i32
    return %c0_i32, %c0_i32_0 : i32, i32
  }
  func.func @transform_4(%arg0: i32) -> (i32, i32) {
    %c0_i32 = arith.constant 0 : i32
    %c0_i32_0 = arith.constant 0 : i32
    %c0_i32_1 = arith.constant 0 : i32
    return %c0_i32, %c0_i32_0 : i32, i32
  }
  func.func @transform_5(%arg0: i32) -> (i32, i32) {
    %c0_i32 = arith.constant 0 : i32
    %c0_i32_0 = arith.constant 0 : i32
    %c0_i32_1 = arith.constant 0 : i32
    return %c0_i32, %c0_i32_0 : i32, i32
  }
  func.func @transform_6(%arg0: i32) -> (i32, i32) {
    %c0_i32 = arith.constant 0 : i32
    %c0_i32_0 = arith.constant 0 : i32
    %c0_i32_1 = arith.constant 0 : i32
    return %c0_i32, %c0_i32_0 : i32, i32
  }
  func.func @transform_7(%arg0: i32) -> (i32, i32) {
    %c0_i32 = arith.constant 0 : i32
    %c0_i32_0 = arith.constant 0 : i32
    %c0_i32_1 = arith.constant 0 : i32
    return %c0_i32, %c0_i32_0 : i32, i32
  }
  func.func @transform_8(%arg0: i32) -> (i32, i32) {
    %c0_i32 = arith.constant 0 : i32
    %c0_i32_0 = arith.constant 0 : i32
    %c0_i32_1 = arith.constant 0 : i32
    return %c0_i32, %c0_i32_0 : i32, i32
  }
  func.func @transform_9(%arg0: i32) -> (i32, i32) {
    %c0_i32 = arith.constant 0 : i32
    %c0_i32_0 = arith.constant 0 : i32
    %c0_i32_1 = arith.constant 0 : i32
    return %c0_i32, %c0_i32_0 : i32, i32
  }
  func.func @transform_10(%arg0: i32) -> (i32, i32) {
    %c0_i32 = arith.constant 0 : i32
    %c0_i32_0 = arith.constant 0 : i32
    %c0_i32_1 = arith.constant 0 : i32
    return %c0_i32, %c0_i32_0 : i32, i32
  }
  func.func @transform_11(%arg0: i32) -> (i32, i32) {
    %c0_i32 = arith.constant 0 : i32
    %c0_i32_0 = arith.constant 0 : i32
    %c0_i32_1 = arith.constant 0 : i32
    return %c0_i32, %c0_i32_0 : i32, i32
  }
  func.func @transform_12(%arg0: i32) -> (i32, i32) {
    %c0_i32 = arith.constant 0 : i32
    %c0_i32_0 = arith.constant 0 : i32
    %c0_i32_1 = arith.constant 0 : i32
    return %c0_i32, %c0_i32_0 : i32, i32
  }
  func.func @transform_13(%arg0: i32) -> (i32, i32, i32) {
    %c0_i32 = arith.constant 0 : i32
    %c0_i32_0 = arith.constant 0 : i32
    %c0_i32_1 = arith.constant 0 : i32
    return %arg0, %c0_i32, %c0_i32_0 : i32, i32, i32
  }
}

</mosaic_0001>

<bundles_post_ra>
// kernel: conditional_block2.1
= control target key start
LH: loop header
LB: loop body
LE: loop exit
PB: predicated region body
PF: predicated region fallthrough
CT: control target
= control target key end

     0   :  { %s2626_s25 = smov 0   ;;  %s3132_s0 = inlined_call_operand.vmem [shape: f32[4,32,16], index: 0, kind: input, shape index: {}]   ;;  %s3133_s1 = inlined_call_operand.vmem [shape: f32[4,16,8], index: 1, kind: input, shape index: {}]   ;;  %s3134_s2 = inlined_call_operand.vmem [shape: f32[32,16], index: 2, kind: input, shape index: {}]   ;;  %s3135_s3 = inlined_call_operand.vmem [shape: f32[32,1], index: 3, kind: input, shape index: {}]   ;;  %s3136_s4 = inlined_call_operand.vmem [shape: f32[32,16], index: 4, kind: input, shape index: {}]   ;;  %s3137_s5 = inlined_call_operand.vmem [shape: f32[32,1], index: 5, kind: input, shape index: {}]   ;;  %s3138_s6 = inlined_call_operand.vmem [shape: f32[32,32], index: 6, kind: input, shape index: {}]   ;;  %s3139_s7 = inlined_call_operand.vmem [shape: f32[32,1], index: 7, kind: input, shape index: {}]   ;;  %s3140_s8 = inlined_call_operand.vmem [shape: f32[32,32], index: 8, kind: input, shape index: {}]   ;;  %s3141_s9 = inlined_call_operand.vmem [shape: f32[32,1], index: 9, kind: input, shape index: {}]   ;;  %s3142_s10 = inlined_call_operand.vmem [shape: f32[32,1], index: 10, kind: input, shape index: {}]   ;;  %s3143_s11 = inlined_call_operand.vmem [shape: f32[32,1], index: 11, kind: input, shape index: {}]   ;;  %s3144_s12 = inlined_call_operand.vmem [shape: f32[32,32], index: 12, kind: input, shape index: {}]   ;;  %s3145_s13 = inlined_call_operand.vmem [shape: f32[4,32,16], index: 13, kind: output, shape index: {}]  }
   0x1 LB: > { %s2087_s26 = sadd.s32 4294967295, %s2553_s25   ;;  %p2091_p0 = scmp.ge.s32.totalorder %s2553_s25, 1  ;;  %s2553_s25 = sphi %s2626_s25, %s23_s25  }
   0x2   : > { %p401_p1 = scmp.lt.s32.totalorder %s2553_s25, 3 }
   0x4   : > { %p402_p2 = pnand %p2091_p0, %p401_p1 }
   0x5   : > { %s2092_s27 = sshll.u32 (!%p402_p2), %s2087_s26, 1  ;;  %v2637_v0 = vld [vmem:[%s3134_s2] sm:$0xff] (!%p402_p2)  ;;  %vm644_vm0 = vcmask (!%p402_p2), 130048   ;;  %v2555_v2 = vmov (!%p402_p2), 0   ;;  %v520_v4 = vld [vmem:[%s3137_s5 + $0x10] sm:$0xff] (!%p402_p2)  ;;  %v519_v5 = vld [vmem:[%s3137_s5 + $0x8] sm:$0xff] (!%p402_p2) }
   0x6   : > { %405 = sbr.rel (%p402_p2) target bundleno = 2347 (0x92b), region = 72  ;;  %v2642_v1 = vld [vmem:[%s3136_s4] sm:$0xff] (!%p402_p2)  ;;  %p454_p3 = scmp.lt.s32.totalorder (!%p402_p2), %s2092_s27, 3  ;;  %2264 = vmatprep.mubr.msk.f32.mxu0 (!%p402_p2), %vm644_vm0, %v2637_v0  ;;  %2509 = vset.pattern.permute.xlu0 (!%p402_p2), %v2555_v2  ;;  %v521_v6 = vld [vmem:[%s3137_s5 + $0x18] sm:$0xff] (!%p402_p2)  ;;  %v495_v11 = vld [vmem:[%s3135_s3 + $0x8] sm:$0xff] (!%p402_p2)  ;;  %vm839_vm1 = vcmask (!%p402_p2), 261120  }
   0x7   : > { %2274 = vmatprep.mubr.msk.f32.mxu1 (!%p402_p2), %vm644_vm0, %v2642_v1  ;;  %v518_v3 = vld [vmem:[%s3137_s5] sm:$0xff] (!%p402_p2)  ;;  %2510 = vset.pattern.permute.xlu1 (!%p402_p2), %v2555_v2  ;;  %v2679_v12 = vld [vmem:[%s3134_s2 + $0x8] sm:$0xff] (!%p402_p2)  ;;  %v2689_v14 = vld [vmem:[%s3134_s2 + $0x10] sm:$0xff] (!%p402_p2)  ;;  %vm937_vm2 = vcmask (!%p402_p2), 64512  }
   0x8   : > { %524 = vperm.xlu0 (!%p402_p2), %2509, %v518_v3   ;;  %534 = vperm.xlu1 (!%p402_p2), %2510, %v520_v4   ;;  %v494_v10 = vld [vmem:[%s3135_s3] sm:$0xff] (!%p402_p2)  ;;  %v2684_v13 = vld [vmem:[%s3136_s4 + $0x8] sm:$0xff] (!%p402_p2)  ;;  %v2694_v15 = vld [vmem:[%s3136_s4 + $0x10] sm:$0xff] (!%p402_p2) }
   0x9   : > { %v496_v16 = vld [vmem:[%s3135_s3 + $0x10] sm:$0xff] (!%p402_p2)  ;;  %v497_v17 = vld [vmem:[%s3135_s3 + $0x18] sm:$0xff] (!%p402_p2)  ;;  %v2751_v26 = vld [vmem:[%s3138_s6] sm:$0xff] (!%p402_p2) }
   0xa   : > { %v2713_v18 = vld [vmem:[%s3134_s2 + $0x18] sm:$0xff] (!%p402_p2)  ;;  %v483_v27 = vld [vmem:[%s3138_s6 + $0x8] sm:$0xff] (!%p402_p2)  ;;  %vm2774_vm3 = vmpackc.low (!%p402_p2), %vm937_vm2, %vm937_vm2 }
   0xb   : > { %v2718_v19 = vld [vmem:[%s3136_s4 + $0x18] sm:$0xff] (!%p402_p2)  ;;  %v2847_v4 = vld [vmem:[%s3144_s12 + $0x8] sm:$0xff] (!%p402_p2) }
   0xc   : > { %529 = vperm.xlu0 (!%p402_p2), %2509, %v519_v5   ;;  %539 = vperm.xlu1 (!%p402_p2), %2510, %v521_v6   ;;  %v485_v2 = vld [vmem:[%s3138_s6 + $0x18] sm:$0xff] (!%p402_p2) }
   0xd   : > { %s3149_s27 = smov (!%p454_p3, %s2092_s27), 3 }
   0xe   : > { %s2170_s21 = sshll.u32 %s3149_s27, 4  ;;  %s2169_s18 = sshll.u32 %s3149_s27, 5 }
   0xf   : > { %s2666_s28 = scalar_lea.vmem %s3133_s1, %s2170_s21  ;;  %s2730_s21 = scalar_lea.vmem %s3132_s0, %s2169_s18 }
  0x10   : > { %v642_v7 = vld [vmem:[%s2666_s28] sm:$0xff]  ;;  %v643_v8 = vld [vmem:[%s2666_s28 + $0x8] sm:$0xff]  ;;  %500 = vperm.xlu0 %2509, %v494_v10   ;;  %505 = vperm.xlu1 %2510, %v495_v11   ;;  %v2741_v23 = vld [vmem:[%s2730_s21 + $0x10] sm:$0xff]  ;;  %s3073_s24 = scalar_lea.vmem %s3145_s13, %s2169_s18 }
  0x11   : > { %v2412_v9 = vpack.c.bf16 %v643_v8, %v642_v7  ;;  %v2733_v20 = vld [vmem:[%s2730_s21] sm:$0xff]  ;;  %v2736_v21 = vld [vmem:[%s2730_s21 + $0x8] sm:$0xff]  ;;  %v2744_v24 = vld [vmem:[%s2730_s21 + $0x18] sm:$0xff] }
  0x12   : > { %v2420_v22 = vpack.c.bf16 %v2736_v21, %v2733_v20  ;;  %v2424_v25 = vpack.c.bf16 %v2744_v24, %v2741_v23  ;;  %v2133_v49 = vld [vmem:[%s2666_s28 + $0x10] sm:$0xff]  ;;  %v2134_v50 = vld [vmem:[%s2666_s28 + $0x18] sm:$0xff]  ;;  %v2797_v53 = vld [vmem:[%s2730_s21 + $0x20] sm:$0xff] }
  0x13   : > { %2413 = vmatprep.subr.bf16.mxu0 %v2412_v9  ;;  %2417 = vmatprep.subr.bf16.mxu1 %v2412_v9  ;;  %v2789_v51 = vpack.c.bf16 %v2134_v50, %v2133_v49  ;;  %v2800_v54 = vld [vmem:[%s2730_s21 + $0x28] sm:$0xff]  ;;  %v2815_v61 = vld [vmem:[%s2730_s21 + $0x30] sm:$0xff]  ;;  %v2818_v62 = vld [vmem:[%s2730_s21 + $0x38] sm:$0xff] }
  0x14   : > { %2415 = vmatpush3.bf16.msra.mxu0 %v2412_v9  ;;  %2419 = vmatpush3.bf16.msra.mxu1 %v2412_v9  ;;  %v2464_v57 = vpack.c.bf16 %v2800_v54, %v2797_v53  ;;  %v2468_v63 = vpack.c.bf16 %v2818_v62, %v2815_v61  ;;  %v2852_v7 = vld [vmem:[%s3144_s12] sm:$0xff] }
  0x15   : > { %510 = vperm.xlu0 %2509, %v496_v16   ;;  %515 = vperm.xlu1 %2510, %v497_v17   ;;  %v2860_v16 = vld [vmem:[%s3144_s12 + $0x10] sm:$0xff] }
  0x16   : > { %2421 = vmatprep.subr.bf16.mxu0 %v2420_v22 }
  0x17   : > { %2265 = vmatmul.mubr.msk.f32.vlgmr.msra.gmra.mrb[0].mxu0 %vm644_vm0, %v2679_v12  ;;  %2275 = vmatmul.mubr.msk.f32.vlgmr.msra.gmra.mrb[0].mxu1 %vm644_vm0, %v2684_v13 }
  0x18   : > { %2267 = vmatprep.mubr.msk.f32.mxu0 %vm644_vm0, %v2689_v14  ;;  %2277 = vmatprep.mubr.msk.f32.mxu1 %vm644_vm0, %v2694_v15 }
  0x19   : > { %2423 = vmatpush3.bf16.msra.mxu0 %v2420_v22 }
  0x1a   : > { %2425 = vmatprep.subr.bf16.mxu0 %v2424_v25 }
  0x1b   : > { %2268 = vmatmul.mubr.msk.f32.gmra.mrb[2].mxu0 %vm644_vm0, %v2713_v18  ;;  %2278 = vmatmul.mubr.msk.f32.gmra.mrb[2].mxu1 %vm644_vm0, %v2718_v19 }
  0x1c   : > { %2288 = vmatprep.mubr.msk.f32.mxu0 %vm839_vm1, %v2751_v26 }
  0x1d   : > { %2427 = vmatpush3.bf16.msra.mxu0 %v2424_v25  ;;  %v2866_v25 = vld [vmem:[%s3144_s12 + $0x18] sm:$0xff] }
  0x20   : > { %2289 = vmatmul.mubr.msk.f32.vlgmr.msra.gmra.mrb[4].mxu0 %vm839_vm1, %v483_v27 }
  0x87   : > { %v2759_v28 = vpop.permute.xlu0 %524  ;;  %v2763_v30 = vpop.permute.xlu1 %534 }
  0x8b   : > { %v2761_v29 = vpop.permute.xlu0 %529  ;;  %v2770_v39 = vpop.permute.xlu1 %539 }
  0x8f   : > { %v2765_v31 = vpop.permute.xlu0 %500  ;;  %v2791_v52 = vpop.permute.xlu1 %505 }
  0x94   : > { %v2802_v55 = vpop.permute.xlu0 %510  ;;  %v2807_v58 = vpop.permute.xlu1 %515 }
  0xea   : > { %v2266_v32 = vpop.f32.mrb[0].mxu0  ;;  %v2276_v33 = vpop.f32.mrb[0].mxu1 }
  0xeb   : > { %v826_v34 = vadd.f32 %v2276_v33, %v2761_v29  ;;  %v723_v35 = vpop.f32.mrb[1].mxu0  ;;  %v820_v36 = vpop.f32.mrb[1].mxu1  ;;  %v729_v56 = vadd.f32 %v2266_v32, %v2791_v52 }
  0xec   : > { %v724_v37 = vadd.f32 %v723_v35, %v2765_v31  ;;  %v821_v38 = vadd.f32 %v820_v36, %v2759_v28 }
  0xee   : > { %v2428_v41 = vpack.c.bf16 %v826_v34, %v821_v38  ;;  %v2269_v42 = vpop.f32.mrb[2].mxu0  ;;  %v2279_v43 = vpop.f32.mrb[2].mxu1  ;;  %2302 = vmatprep.mubr.msk.f32.mxu1 %vm937_vm2, %v724_v37  ;;  %v542_v38 = vld [vmem:[%s3139_s7] sm:$0xff] }
  0xef   : > { %v836_v44 = vadd.f32 %v2279_v43, %v2770_v39  ;;  %v733_v45 = vpop.f32.mrb[3].mxu0  ;;  %v830_v46 = vpop.f32.mrb[3].mxu1  ;;  %v739_v60 = vadd.f32 %v2269_v42, %v2807_v58 }
  0xf0   : > { %v831_v47 = vadd.f32 %v830_v46, %v2763_v30  ;;  %2430 = vmatprep.subr.msk.bf16.mxu1 %vm2774_vm3, %v2428_v41  ;;  %v734_v59 = vadd.f32 %v733_v45, %v2802_v55 }
  0xf1   : > { %2433 = vmatpush3.bf16.xpose.msk.msra.mxu1 %vm2774_vm3, %v2428_v41 }
  0xf2   : > { %v2434_v48 = vpack.c.bf16 %v836_v44, %v831_v47 }
  0xf3   : > { %v2290_v41 = vpop.f32.mrb[4].mxu0 }
  0xf4   : > { %2436 = vmatprep.subr.msk.bf16.mxu1 %vm2774_vm3, %v2434_v48  ;;  %v918_v43 = vpop.f32.mrb[5].mxu0 }
  0xf9   : > { %2439 = vmatpush3.bf16.xpose.msk.msra.mxu1 %vm2774_vm3, %v2434_v48 }
  0xfa   : > { %2457 = vmatprep.subr.bf16.mxu1 %v2789_v51 }
 0x100   : > { %2303 = vmatmul.mubr.msk.f32.vlgmr.msra.gmra.mrb[4].mxu1 %vm937_vm2, %v729_v56 }
 0x101   : > { %2305 = vmatprep.mubr.msk.f32.mxu1 %vm937_vm2, %v734_v59  ;;  %2459 = vmatpush3.bf16.msra.mxu1 %v2789_v51 }
 0x102   : > { %2465 = vmatprep.subr.bf16.mxu1 %v2464_v57 }
 0x104   : > { %2306 = vmatmul.mubr.msk.f32.gmra.mrb[6].mxu1 %vm937_vm2, %v739_v60 }
 0x105   : > { %2340 = vmatprep.mubr.msk.f32.mxu1 %vm644_vm0, %v2637_v0  ;;  %v484_v0 = vld [vmem:[%s3138_s6 + $0x10] sm:$0xff] }
 0x106   : > { %2291 = vmatprep.mubr.msk.f32.mxu0 %vm839_vm1, %v484_v0 }
 0x107   : > { %2292 = vmatmul.mubr.msk.f32.gmra.mrb[6].mxu0 %vm839_vm1, %v485_v2 }
 0x108   : > { %2341 = vmatmul.mubr.msk.f32.vlgmr.msra.gmra.mrb[8].mxu1 %vm644_vm0, %v2679_v12 }
 0x109   : > { %2343 = vmatprep.mubr.msk.f32.mxu1 %vm644_vm0, %v2689_v14  ;;  %2467 = vmatpush3.bf16.msra.mxu1 %v2464_v57 }
 0x10a   : > { %2469 = vmatprep.subr.bf16.mxu1 %v2468_v63 }
 0x10c   : > { %2344 = vmatmul.mubr.msk.f32.gmra.mrb[10].mxu1 %vm644_vm0, %v2713_v18 }
 0x10d   : > { %2471 = vmatpush3.bf16.msra.mxu1 %v2468_v63  ;;  %2364 = vmatprep.mubr.msk.f32.mxu1 %vm839_vm1, %v2751_v26 }
 0x110   : > { %2365 = vmatmul.mubr.msk.f32.vlgmr.msra.gmra.mrb[12].mxu1 %vm839_vm1, %v483_v27 }
 0x111   : > { %2367 = vmatprep.mubr.msk.f32.mxu1 %vm839_vm1, %v484_v0 }
 0x114   : > { %2368 = vmatmul.mubr.msk.f32.gmra.mrb[14].mxu1 %vm839_vm1, %v485_v2 }
 0x1d3   : > { %v2304_v3 = vpop.f32.mrb[4].mxu1 }
 0x1d4   : > { %v1048_v5 = vmul.f32 0.09090909, %v2304_v3  ;;  %v1028_v6 = vpop.f32.mrb[5].mxu1 }
 0x1d5   : > { %v1047_v8 = vmul.f32 0.09090909, %v1028_v6 }
 0x1d6   : > { %v1052_v9 = vadd.f32 %v1048_v5, %v2847_v4 }
 0x1d7   : > { %v2307_v10 = vpop.f32.mrb[6].mxu1  ;;  %v1051_v11 = vadd.f32 %v1047_v8, %v2852_v7  ;;  %v544_v8 = vld [vmem:[%s3139_s7 + $0x10] sm:$0xff] }
 0x1d8   : > { %v1038_v12 = vpop.f32.mrb[7].mxu1  ;;  %v1058_v14 = vsel %vm839_vm1, %v1052_v9, -inf  ;;  %v1050_v17 = vmul.f32 0.09090909, %v2307_v10 }
 0x1d9   : > { %v1049_v18 = vmul.f32 0.09090909, %v1038_v12  ;;  %1059 = vmax.xlane.f32.xlu1 %v1058_v14  ;;  %v1055_v22 = vsel %vm839_vm1, %v1051_v11, -inf  ;;  %v543_v14 = vld [vmem:[%s3139_s7 + $0x8] sm:$0xff] }
 0x1da   : > { %1056 = vmax.xlane.f32.xlu0 %v1055_v22  ;;  %v1054_v34 = vadd.f32 %v1050_v17, %v2866_v25 }
 0x1db   : > { %v2868_v26 = vpop.f32.mrb[8].mxu1  ;;  %v1053_v27 = vadd.f32 %v1049_v18, %v2860_v16 }
 0x1dc   : > { %v2871_v32 = vpop.f32.mrb[9].mxu1  ;;  %v1064_v37 = vsel %vm839_vm1, %v1054_v34, -inf }
 0x1dd   : > { %v1061_v33 = vsel %vm839_vm1, %v1053_v27, -inf }
 0x1de   : > { %1062 = vmax.xlane.f32.xlu0 %v1061_v33 }
 0x1df   : > { %v2875_v35 = vpop.f32.mrb[10].mxu1 }
 0x1e0   : > { %v2877_v36 = vpop.f32.mrb[11].mxu1 }
 0x1e2   : > { %1065 = vmax.xlane.f32.xlu0 %v1064_v37 }
 0x1e3   : > { %v2366_v42 = vpop.f32.mrb[12].mxu1 }
 0x1e4   : > { %v1596_v44 = vpop.f32.mrb[13].mxu1 }
 0x1e7   : > { %v2369_v10 = vpop.f32.mrb[14].mxu1 }
 0x1e8   : > { %v1606_v12 = vpop.f32.mrb[15].mxu1 }
 0x1ea   : > { %548 = vperm.xlu1 %2510, %v542_v38  }
 0x266   : > { %v1060_v45 = vpop.xlane.xlu1 %1059 }
 0x267   : > { %v1068_v46 = vsub.f32 %v1052_v9, %v1060_v45  ;;  %v1057_v47 = vpop.xlane.xlu0 %1056  ;;  %v2293_v9 = vpop.f32.mrb[6].mxu0 }
 0x268   : > { %v1067_v48 = vsub.f32 %v1051_v11, %v1057_v47  ;;  %v928_v11 = vpop.f32.mrb[7].mxu0 }
 0x269   : > { %v1073_v49 = vmul.f32 1.442695, %v1068_v46 }
 0x26a   : > { %v1071_v50 = vmul.f32 1.442695, %v1067_v48  ;;  %v549_v37 = vpop.permute.xlu1 %548 }
 0x26b   : > { %2511 = vpow2.f32 %v1073_v49  ;;  %v1063_v56 = vpop.xlane.xlu0 %1062  ;;  %v919_v49 = vadd.f32 %v918_v43, %v549_v37 }
 0x26c   : > { %2513 = vpow2.f32 %v1071_v50  ;;  %v1069_v17 = vsub.f32 %v1053_v27, %v1063_v56  ;;  %v1597_v50 = vadd.f32 %v1596_v44, %v549_v37 }
 0x26e   : > { %v1075_v18 = vmul.f32 1.442695, %v1069_v17 }
 0x26f   : > { %v1066_v57 = vpop.xlane.xlu0 %1065 }
 0x270   : > { %v1070_v59 = vsub.f32 %v1054_v34, %v1066_v57  ;;  %v545_v34 = vld [vmem:[%s3139_s7 + $0x18] sm:$0xff] }
 0x272   : > { %v1077_v60 = vmul.f32 1.442695, %v1070_v59 }
 0x274   : > { %2515 = vpow2.f32 %v1077_v60 }
 0x275   : > { %v2512_v63 = vpop.eup %2511  ;;  %2517 = vpow2.f32 %v1075_v18 }
 0x276   : > { %v2514_v0 = vpop.eup %2513  ;;  %v1082_v2 = vsel %vm839_vm1, %v2512_v63, 0.0 }
 0x277   : > { %1083 = vadd.xlane.f32.xlu0 %v1082_v2  ;;  %v1079_v3 = vsel %vm839_vm1, %v2514_v0, 0.0 }
 0x278   : > { %1080 = vadd.xlane.f32.xlu1 %v1079_v3 }
 0x27e   : > { %v2516_v5 = vpop.eup %2515 }
 0x27f   : > { %v1088_v6 = vsel %vm839_vm1, %v2516_v5, 0.0  ;;  %v2518_v22 = vpop.eup %2517 }
 0x280   : > { %1089 = vadd.xlane.f32.xlu0 %v1088_v6  ;;  %v1085_v33 = vsel %vm839_vm1, %v2518_v22, 0.0 }
 0x289   : > { %558 = vperm.xlu1 %2510, %v544_v8  }
 0x296   : > { %553 = vperm.xlu0 %2509, %v543_v14  }
 0x2ad   : > { %1086 = vadd.xlane.f32.xlu1 %v1085_v33 }
 0x2be   : > { %563 = vperm.xlu1 %2510, %v545_v34  }
 0x304   : > { %v1084_v45 = vpop.xlane.xlu0 %1083 }
 0x305   : > { %v1081_v38 = vpop.xlane.xlu1 %1080 }
 0x306   : > { %2519 = vrcp.f32 %v1081_v38 }
 0x307   : > { %2521 = vrcp.f32 %v1084_v45  ;;  %v2916_v45 = vld [vmem:[%s3140_s8 + $0x10] sm:$0xff] }
 0x309   : > { %v559_v2 = vpop.permute.xlu1 %558 }
 0x30a   : > { %v1607_v8 = vadd.f32 %v1606_v12, %v559_v2 }
 0x30d   : > { %v1090_v47 = vpop.xlane.xlu0 %1089 }
 0x310   : > { %v2520_v46 = vpop.eup %2519 }
 0x311   : > { %v1092_v48 = vmul.f32 %v2520_v46, %v2514_v0  ;;  %v929_v0 = vadd.f32 %v928_v11, %v559_v2  ;;  %v2926_v46 = vld [vmem:[%s3140_s8 + $0x18] sm:$0xff] }
 0x313   : > { %2316 = vmatprep.mubr.msk.f32.mxu0 %vm839_vm1, %v1092_v48 }
 0x315   : > { %v554_v27 = vpop.permute.xlu0 %553 }
 0x316   : > { %v924_v56 = vadd.f32 %v2290_v41, %v554_v27  ;;  %v1602_v57 = vadd.f32 %v2366_v42, %v554_v27  ;;  %v2522_v41 = vpop.eup %2521 }
 0x317   : > { %v1094_v18 = vmul.f32 %v2522_v41, %v2512_v63 }
 0x318   : > { %v2440_v59 = vpack.c.bf16 %v924_v56, %v919_v49  ;;  %v2484_v60 = vpack.c.bf16 %v1602_v57, %v1597_v50 }
 0x31a   : > { %2441 = vmatprep.subr.bf16.mxu0 %v2440_v59  ;;  %2485 = vmatprep.subr.bf16.mxu1 %v2484_v60 }
 0x31b   : > { %2443 = vmatpush3.bf16.msra.mxu0 %v2440_v59  ;;  %2487 = vmatpush3.bf16.msra.mxu1 %v2484_v60 }
 0x33a   : > { %v1087_v3 = vpop.xlane.xlu1 %1086 }
 0x33b   : > { %2523 = vrcp.f32 %v1087_v3 }
 0x33c   : > { %2525 = vrcp.f32 %v1090_v47 }
 0x33e   : > { %v564_v6 = vpop.permute.xlu1 %563 }
 0x33f   : > { %v934_v14 = vadd.f32 %v2293_v9, %v564_v6  ;;  %v1612_v17 = vadd.f32 %v2369_v10, %v564_v6  ;;  %v2903_v9 = vld [vmem:[%s3140_s8] sm:$0xff] }
 0x341   : > { %v2444_v43 = vpack.c.bf16 %v934_v14, %v929_v0  ;;  %v2488_v44 = vpack.c.bf16 %v1612_v17, %v1607_v8 }
 0x343   : > { %2445 = vmatprep.subr.bf16.mxu0 %v2444_v43  ;;  %2489 = vmatprep.subr.bf16.mxu1 %v2488_v44 }
 0x344   : > { %2447 = vmatpush3.bf16.msra.mxu0 %v2444_v43  ;;  %2491 = vmatpush3.bf16.msra.mxu1 %v2488_v44 }
 0x345   : > { %v2524_v42 = vpop.eup %2523 }
 0x346   : > { %v2526_v33 = vpop.eup %2525  ;;  %v1096_v34 = vmul.f32 %v2524_v42, %v2518_v22 }
 0x347   : > { %2317 = vmatmul.mubr.msk.f32.vlgmr.msra.gmra.mrb[8].mxu0 %vm839_vm1, %v1094_v18  ;;  %v1098_v37 = vmul.f32 %v2526_v33, %v2516_v5  ;;  %v2910_v5 = vld [vmem:[%s3140_s8 + $0x8] sm:$0xff] }
 0x348   : > { %2319 = vmatprep.mubr.msk.f32.mxu0 %vm839_vm1, %v1096_v34 }
 0x34b   : > { %2320 = vmatmul.mubr.msk.f32.gmra.mrb[10].mxu0 %vm839_vm1, %v1098_v37 }
 0x34c   : > { %2330 = vmatprep.mubr.msk.f32.mxu0 %vm839_vm1, %v2903_v9 }
 0x41a   : > { %v2318_v10 = vpop.f32.mrb[8].mxu0 }
 0x41b   : > { %v1177_v11 = vpop.f32.mrb[9].mxu0 }
 0x41c   : > { %v2448_v63 = vpack.c.bf16 %v2318_v10, %v1177_v11 }
 0x41e   : > { %v2321_v12 = vpop.f32.mrb[10].mxu0  ;;  %2449 = vmatprep.subr.bf16.mxu0 %v2448_v63 }
 0x41f   : > { %v1187_v22 = vpop.f32.mrb[11].mxu0  ;;  %2451 = vmatpush3.bf16.msra.mxu0 %v2448_v63 }
 0x420   : > { %v2452_v38 = vpack.c.bf16 %v2321_v12, %v1187_v22 }
 0x422   : > { %2453 = vmatprep.subr.bf16.mxu0 %v2452_v38 }
 0x423   : > { %2455 = vmatpush3.bf16.msra.mxu0 %v2452_v38 }
 0x424   : > { %2461 = vmatprep.subr.bf16.mxu0 %v2789_v51 }
 0x426   : > { %2331 = vmatmul.mubr.msk.f32.vlgmr.msra.gmra.mrb[12].mxu0 %vm839_vm1, %v2910_v5 }
 0x427   : > { %2463 = vmatpush3.bf16.msra.mxu0 %v2789_v51  ;;  %2333 = vmatprep.mubr.msk.f32.mxu0 %vm839_vm1, %v2916_v45  ;;  %v1427_v51 = vadd.f32 %v2871_v32, %v2765_v31 }
 0x42a   : > { %2334 = vmatmul.mubr.msk.f32.gmra.mrb[14].mxu0 %vm839_vm1, %v2926_v46 }
 0x42b   : > { %2350 = vmatprep.mubr.msk.f32.mxu0 %vm644_vm0, %v2642_v1 }
 0x42e   : > { %2351 = vmatmul.mubr.msk.f32.vlgmr.msra.gmra.mrb[16].mxu0 %vm644_vm0, %v2684_v13 }
 0x42f   : > { %2353 = vmatprep.mubr.msk.f32.mxu0 %vm644_vm0, %v2694_v15 }
 0x432   : > { %2354 = vmatmul.mubr.msk.f32.gmra.mrb[18].mxu0 %vm644_vm0, %v2718_v19 }
 0x433   : > { %2378 = vmatprep.mubr.msk.f32.mxu0 %vm937_vm2, %v1427_v51 }
 0x4f9   : > { %v2941_v47 = vpop.f32.mrb[12].mxu0 }
 0x4fa   : > { %v2943_v48 = vpop.f32.mrb[13].mxu0 }
 0x4fd   : > { %v2945_v27 = vpop.f32.mrb[14].mxu0 }
 0x4fe   : > { %v2947_v1 = vpop.f32.mrb[15].mxu0 }
 0x501   : > { %v2352_v13 = vpop.f32.mrb[16].mxu0 }
 0x502   : > { %v1517_v49 = vadd.f32 %v2352_v13, %v2761_v29  ;;  %v1511_v15 = vpop.f32.mrb[17].mxu0  ;;  %v1437_v29 = vadd.f32 %v2877_v36, %v2802_v55 }
 0x503   : > { %v1512_v50 = vadd.f32 %v1511_v15, %v2759_v28  ;;  %v1432_v28 = vadd.f32 %v2868_v26, %v2791_v52  ;;  %v568_v15 = vld [vmem:[%s3141_s9 + $0x10] sm:$0xff] }
 0x505   : > { %v2472_v31 = vpack.c.bf16 %v1517_v49, %v1512_v50  ;;  %v2355_v32 = vpop.f32.mrb[18].mxu0  ;;  %v566_v49 = vld [vmem:[%s3141_s9] sm:$0xff]  ;;  %v569_v50 = vld [vmem:[%s3141_s9 + $0x18] sm:$0xff] }
 0x506   : > { %v1527_v19 = vadd.f32 %v2355_v32, %v2770_v39  ;;  %v1521_v56 = vpop.f32.mrb[19].mxu0  ;;  %v591_v32 = vld [vmem:[%s3142_s10 + $0x8] sm:$0xff] }
 0x507   : > { %v1522_v57 = vadd.f32 %v1521_v56, %v2763_v30  ;;  %2474 = vmatprep.subr.msk.bf16.mxu0 %vm2774_vm3, %v2472_v31  ;;  %v1442_v30 = vadd.f32 %v2875_v35, %v2807_v58  ;;  %v593_v56 = vld [vmem:[%s3142_s10 + $0x18] sm:$0xff] }
 0x508   : > { %2477 = vmatpush3.bf16.xpose.msk.msra.mxu0 %vm2774_vm3, %v2472_v31  ;;  %v567_v31 = vld [vmem:[%s3141_s9 + $0x8] sm:$0xff] }
 0x509   : > { %v2478_v59 = vpack.c.bf16 %v1527_v19, %v1522_v57  ;;  %v590_v19 = vld [vmem:[%s3142_s10] sm:$0xff]  ;;  %v592_v57 = vld [vmem:[%s3142_s10 + $0x10] sm:$0xff] }
 0x50b   : > { %2480 = vmatprep.subr.msk.bf16.mxu0 %vm2774_vm3, %v2478_v59 }
 0x510   : > { %2483 = vmatpush3.bf16.xpose.msk.msra.mxu0 %vm2774_vm3, %v2478_v59  ;;  %v615_v59 = vld [vmem:[%s3143_s11 + $0x8] sm:$0xff] }
 0x517   : > { %2379 = vmatmul.mubr.msk.f32.vlgmr.msra.gmra.mrb[20].mxu0 %vm937_vm2, %v1432_v28  ;;  %v614_v28 = vld [vmem:[%s3143_s11] sm:$0xff] }
 0x518   : > { %2381 = vmatprep.mubr.msk.f32.mxu0 %vm937_vm2, %v1437_v29  ;;  %v617_v29 = vld [vmem:[%s3143_s11 + $0x18] sm:$0xff] }
 0x51b   : > { %2382 = vmatmul.mubr.msk.f32.gmra.mrb[22].mxu0 %vm937_vm2, %v1442_v30  ;;  %v616_v30 = vld [vmem:[%s3143_s11 + $0x10] sm:$0xff] }
 0x5ea   : > { %v2380_v39 = vpop.f32.mrb[20].mxu0 }
 0x5eb   : > { %v1725_v60 = vmul.f32 0.09090909, %v2380_v39  ;;  %v1705_v2 = vpop.f32.mrb[21].mxu0 }
 0x5ec   : > { %v1724_v40 = vmul.f32 0.09090909, %v1705_v2 }
 0x5ed   : > { %v1729_v3 = vadd.f32 %v1725_v60, %v2847_v4 }
 0x5ee   : > { %v2383_v6 = vpop.f32.mrb[22].mxu0  ;;  %v1728_v52 = vadd.f32 %v1724_v40, %v2852_v7 }
 0x5ef   : > { %v1715_v26 = vpop.f32.mrb[23].mxu0  ;;  %v1735_v55 = vsel %vm839_vm1, %v1729_v3, -inf  ;;  %v1727_v36 = vmul.f32 0.09090909, %v2383_v6 }
 0x5f0   : > { %v1726_v0 = vmul.f32 0.09090909, %v1715_v26  ;;  %1736 = vmax.xlane.f32.xlu1 %v1735_v55  ;;  %v1732_v8 = vsel %vm839_vm1, %v1728_v52, -inf }
 0x5f1   : > { %1733 = vmax.xlane.f32.xlu0 %v1732_v8  ;;  %v1731_v14 = vadd.f32 %v1727_v36, %v2866_v25 }
 0x5f2   : > { %v1730_v58 = vadd.f32 %v1726_v0, %v2860_v16 }
 0x5f3   : > { %v1741_v4 = vsel %vm839_vm1, %v1731_v14, -inf }
 0x5f4   : > { %v1738_v35 = vsel %vm839_vm1, %v1730_v58, -inf }
 0x5f5   : > { %1739 = vmax.xlane.f32.xlu0 %v1738_v35 }
 0x5f9   : > { %1742 = vmax.xlane.f32.xlu0 %v1741_v4 }
 0x67d   : > { %v1737_v7 = vpop.xlane.xlu1 %1736 }
 0x67e   : > { %v1745_v17 = vsub.f32 %v1729_v3, %v1737_v7  ;;  %v1734_v43 = vpop.xlane.xlu0 %1733 }
 0x67f   : > { %v1744_v44 = vsub.f32 %v1728_v52, %v1734_v43 }
 0x680   : > { %v1750_v41 = vmul.f32 1.442695, %v1745_v17 }
 0x681   : > { %v1748_v42 = vmul.f32 1.442695, %v1744_v44 }
 0x682   : > { %2527 = vpow2.f32 %v1750_v41  ;;  %v1740_v18 = vpop.xlane.xlu0 %1739 }
 0x683   : > { %2529 = vpow2.f32 %v1748_v42  ;;  %v1746_v33 = vsub.f32 %v1730_v58, %v1740_v18 }
 0x685   : > { %v1752_v34 = vmul.f32 1.442695, %v1746_v33 }
 0x686   : > { %v1743_v16 = vpop.xlane.xlu0 %1742 }
 0x687   : > { %2531 = vpow2.f32 %v1752_v34  ;;  %v1747_v37 = vsub.f32 %v1731_v14, %v1743_v16 }
 0x689   : > { %v1754_v10 = vmul.f32 1.442695, %v1747_v37 }
 0x68b   : > { %2533 = vpow2.f32 %v1754_v10 }
 0x68c   : > { %v2528_v25 = vpop.eup %2527 }
 0x68d   : > { %v2530_v11 = vpop.eup %2529  ;;  %v1759_v63 = vsel %vm839_vm1, %v2528_v25, 0.0 }
 0x68e   : > { %1760 = vadd.xlane.f32.xlu0 %v1759_v63  ;;  %v1756_v12 = vsel %vm839_vm1, %v2530_v11, 0.0 }
 0x68f   : > { %1757 = vadd.xlane.f32.xlu1 %v1756_v12 }
 0x691   : > { %v2532_v22 = vpop.eup %2531 }
 0x692   : > { %v1762_v38 = vsel %vm839_vm1, %v2532_v22, 0.0 }
 0x693   : > { %1763 = vadd.xlane.f32.xlu1 %v1762_v38 }
 0x695   : > { %v2534_v51 = vpop.eup %2533 }
 0x696   : > { %v1765_v13 = vsel %vm839_vm1, %v2534_v51, 0.0 }
 0x697   : > { %1766 = vadd.xlane.f32.xlu0 %v1765_v13 }
 0x6a4   : > { %572 = vperm.xlu1 %2510, %v566_v49  }
 0x6a8   : > { %582 = vperm.xlu1 %2510, %v568_v15  }
 0x6ac   : > { %587 = vperm.xlu1 %2510, %v569_v50  }
 0x6ad   : > { %577 = vperm.xlu0 %2509, %v567_v31  }
 0x6b0   : > { %601 = vperm.xlu1 %2510, %v591_v32  }
 0x6b1   : > { %596 = vperm.xlu0 %2509, %v590_v19  }
 0x6b4   : > { %611 = vperm.xlu1 %2510, %v593_v56  }
 0x6b5   : > { %606 = vperm.xlu0 %2509, %v592_v57  }
 0x6b8   : > { %625 = vperm.xlu1 %2510, %v615_v59  }
 0x6b9   : > { %620 = vperm.xlu0 %2509, %v614_v28  }
 0x6bc   : > { %635 = vperm.xlu1 %2510, %v617_v29  }
 0x6bd   : > { %630 = vperm.xlu0 %2509, %v616_v30  }
 0x71b   : > { %v1761_v39 = vpop.xlane.xlu0 %1760 }
 0x71c   : > { %2535 = vrcp.f32 %v1761_v39  ;;  %v1758_v60 = vpop.xlane.xlu1 %1757 }
 0x71d   : > { %2537 = vrcp.f32 %v1758_v60 }
 0x720   : > { %v1764_v2 = vpop.xlane.xlu1 %1763 }
 0x721   : > { %2539 = vrcp.f32 %v1764_v2 }
 0x724   : > { %v3018_v40 = vpop.permute.xlu1 %572  ;;  %v1767_v3 = vpop.xlane.xlu0 %1766 }
 0x725   : > { %2541 = vrcp.f32 %v1767_v3  ;;  %v1275_v0 = vadd.f32 %v2943_v48, %v3018_v40 }
 0x726   : > { %v2536_v6 = vpop.eup %2535 }
 0x727   : > { %v2538_v52 = vpop.eup %2537  ;;  %v1771_v36 = vmul.f32 %v2536_v6, %v2528_v25  ;;  %v1293_v7 = vadd.f32 %v1275_v0, %v2733_v20 }
 0x728   : > { %v3020_v26 = vpop.permute.xlu1 %582  ;;  %v1769_v55 = vmul.f32 %v2538_v52, %v2530_v11 }
 0x729   : > { %v1285_v58 = vadd.f32 %v2947_v1, %v3020_v26  ;;  %v1297_v42 = vsel %vm644_vm0, %v1293_v7, 0.0 }
 0x72a   : > { %2392 = vmatprep.mubr.msk.f32.mxu1 %vm839_vm1, %v1769_v55 }
 0x72b   : > { %v2540_v8 = vpop.eup %2539  ;;  %2393 = vmatmul.mubr.msk.f32.vlgmr.msra.gmra.mrb[16].mxu1 %vm839_vm1, %v1771_v36  ;;  %v1295_v1 = vadd.f32 %v1285_v58, %v2741_v23 }
 0x72c   : > { %v3028_v35 = vpop.permute.xlu1 %587  ;;  %v3030_v14 = vpop.permute.xlu0 %577  ;;  %v1773_v4 = vmul.f32 %v2540_v8, %v2532_v22 }
 0x72d   : > { %v1290_v17 = vadd.f32 %v2945_v27, %v3028_v35  ;;  %v1280_v48 = vadd.f32 %v2941_v47, %v3030_v14  ;;  %v1300_v27 = vsel %vm644_vm0, %v1295_v1, 0.0 }
 0x72e   : > { %2395 = vmatprep.mubr.msk.f32.mxu1 %vm839_vm1, %v1773_v4 }
 0x72f   : > { %v2542_v43 = vpop.eup %2541  ;;  %v1294_v44 = vadd.f32 %v1280_v48, %v2736_v21  ;;  %v1296_v18 = vadd.f32 %v1290_v17, %v2744_v24 }
 0x730   : > { %v1775_v41 = vmul.f32 %v2542_v43, %v2534_v51  ;;  %v3052_v2 = vpop.permute.xlu1 %601  ;;  %v3054_v6 = vpop.permute.xlu0 %596 }
 0x731   : > { %v1298_v20 = vsel %vm644_vm0, %v1294_v44, 0.0  ;;  %v1302_v23 = vsel %vm644_vm0, %v1296_v18, 0.0 }
 0x732   : > { %v1299_v33 = vadd.f32 %v1298_v20, %v1297_v42  ;;  %2396 = vmatmul.mubr.msk.f32.gmra.mrb[18].mxu1 %vm839_vm1, %v1775_v41 }
 0x733   : > { %2406 = vmatprep.mubr.msk.f32.mxu1 %vm839_vm1, %v2903_v9 }
 0x734   : > { %v1301_v47 = vadd.f32 %v1300_v27, %v1299_v33  ;;  %v3056_v55 = vpop.permute.xlu1 %611  ;;  %v3058_v36 = vpop.permute.xlu0 %606 }
 0x736   : > { %v1303_v34 = vadd.f32 %v1302_v23, %v1301_v47 }
 0x738   : > { %v1304_v21 = vrot.slane %v1303_v34, 4  ;;  %v3060_v0 = vpop.permute.xlu1 %625  ;;  %v3062_v8 = vpop.permute.xlu0 %620 }
 0x73a   : > { %v1305_v16 = vadd.f32 %v1304_v21, %v1303_v34 }
 0x73c   : > { %v1306_v37 = vrot.slane %v1305_v16, 2  ;;  %v3075_v42 = vpop.permute.xlu1 %635 }
 0x73e   : > { %v1307_v10 = vadd.f32 %v1306_v37, %v1305_v16 }
 0x740   : > { %v1308_v25 = vrot.slane %v1307_v10, 1 }
 0x742   : > { %v1309_v24 = vadd.f32 %v1308_v25, %v1307_v10 }
 0x744   : > { %v1311_v11 = vmul.f32 0.03125, %v1309_v24 }
 0x746   : > { %v1315_v63 = vsub.f32 %v1296_v18, %v1311_v11  ;;  %v1312_v12 = vsub.f32 %v1293_v7, %v1311_v11  ;;  %v1313_v22 = vsub.f32 %v1294_v44, %v1311_v11  ;;  %v1314_v38 = vsub.f32 %v1295_v1, %v1311_v11  ;;  %v3077_v18 = vpop.permute.xlu0 %630 }
 0x748   : > { %v1316_v51 = vmul.f32 %v1312_v12, %v1312_v12  ;;  %v1317_v13 = vmul.f32 %v1313_v22, %v1313_v22  ;;  %v1318_v49 = vmul.f32 %v1314_v38, %v1314_v38  ;;  %v1319_v15 = vmul.f32 %v1315_v63, %v1315_v63 }
 0x74a   : > { %v1320_v9 = vsel %vm644_vm0, %v1316_v51, 0.0  ;;  %v1321_v50 = vsel %vm644_vm0, %v1317_v13, 0.0  ;;  %v1323_v32 = vsel %vm644_vm0, %v1318_v49, 0.0  ;;  %v1325_v56 = vsel %vm644_vm0, %v1319_v15, 0.0 }
 0x74b   : > { %v1322_v31 = vadd.f32 %v1321_v50, %v1320_v9 }
 0x74d   : > { %v1324_v19 = vadd.f32 %v1323_v32, %v1322_v31 }
 0x74f   : > { %v1326_v57 = vadd.f32 %v1325_v56, %v1324_v19 }
 0x751   : > { %v1327_v59 = vrot.slane %v1326_v57, 4 }
 0x753   : > { %v1328_v28 = vadd.f32 %v1327_v59, %v1326_v57 }
 0x755   : > { %v1329_v29 = vrot.slane %v1328_v28, 2 }
 0x757   : > { %v1330_v30 = vadd.f32 %v1329_v29, %v1328_v28 }
 0x759   : > { %v1331_v39 = vrot.slane %v1330_v30, 1 }
 0x75b   : > { %v1332_v60 = vadd.f32 %v1331_v39, %v1330_v30 }
 0x75d   : > { %v1333_v3 = vmul.f32 0.03125, %v1332_v60 }
 0x75f   : > { %v1334_v52 = vadd.f32 1e-05, %v1333_v3 }
 0x761   : > { %2543 = vrsqrt.f32 %v1334_v52 }
 0x76b   : > { %v2544_v58 = vpop.eup %2543 }
 0x76c   : > { %v1337_v4 = vmul.f32 %v2544_v58, %v1313_v22  ;;  %v1336_v7 = vmul.f32 %v2544_v58, %v1312_v12  ;;  %v1339_v17 = vmul.f32 %v2544_v58, %v1315_v63  ;;  %v1338_v48 = vmul.f32 %v2544_v58, %v1314_v38 }
 0x76e   : > { %v1341_v43 = vmul.f32 %v1337_v4, %v3052_v2  ;;  %v1340_v1 = vmul.f32 %v1336_v7, %v3054_v6  ;;  %v1343_v44 = vmul.f32 %v1339_v17, %v3056_v55  ;;  %v1342_v41 = vmul.f32 %v1338_v48, %v3058_v36 }
 0x770   : > { %v1345_v20 = vadd.f32 %v1341_v43, %v3060_v0  ;;  %v1344_v33 = vadd.f32 %v1340_v1, %v3062_v8  ;;  %v1347_v27 = vadd.f32 %v1343_v44, %v3075_v42  ;;  %v1346_v47 = vadd.f32 %v1342_v41, %v3077_v18 }
 0x772   : > { %1349 = vst.msk [vmem:[%s3073_s24 + $0x8] sm:$0xff] %vm644_vm0, %v1345_v20  ;;  %1348 = vst.msk [vmem:[%s3073_s24] sm:$0xff] %vm644_vm0, %v1344_v33 }
 0x773   : > { %1351 = vst.msk [vmem:[%s3073_s24 + $0x18] sm:$0xff] %vm644_vm0, %v1347_v27  ;;  %1350 = vst.msk [vmem:[%s3073_s24 + $0x10] sm:$0xff] %vm644_vm0, %v1346_v47 }
 0x7fe   : > { %v2394_v23 = vpop.f32.mrb[16].mxu1 }
 0x7ff   : > { %v1854_v34 = vpop.f32.mrb[17].mxu1 }
 0x800   : > { %v2492_v21 = vpack.c.bf16 %v2394_v23, %v1854_v34 }
 0x802   : > { %2493 = vmatprep.subr.bf16.mxu1 %v2492_v21 }
 0x803   : > { %2495 = vmatpush3.bf16.msra.mxu1 %v2492_v21 }
 0x805   : > { %v2397_v16 = vpop.f32.mrb[18].mxu1 }
 0x806   : > { %v1864_v37 = vpop.f32.mrb[19].mxu1 }
 0x807   : > { %v2496_v10 = vpack.c.bf16 %v2397_v16, %v1864_v37 }
 0x809   : > { %2497 = vmatprep.subr.bf16.mxu1 %v2496_v10 }
 0x80a   : > { %2499 = vmatpush3.bf16.msra.mxu1 %v2496_v10 }
 0x80d   : > { %2407 = vmatmul.mubr.msk.f32.vlgmr.msra.gmra.mrb[20].mxu1 %vm839_vm1, %v2910_v5 }
 0x80e   : > { %2409 = vmatprep.mubr.msk.f32.mxu1 %vm839_vm1, %v2916_v45 }
 0x811   : > { %2410 = vmatmul.mubr.msk.f32.gmra.mrb[22].mxu1 %vm839_vm1, %v2926_v46 }
 0x8e0   : > { %v2408_v25 = vpop.f32.mrb[20].mxu1 }
 0x8e1   : > { %v1945_v24 = vadd.f32 %v2408_v25, %v3030_v14  ;;  %v1939_v11 = vpop.f32.mrb[21].mxu1 }
 0x8e2   : > { %v1940_v63 = vadd.f32 %v1939_v11, %v3018_v40 }
 0x8e3   : > { %v1959_v12 = vadd.f32 %v2800_v54, %v1945_v24 }
 0x8e4   : > { %v1958_v22 = vadd.f32 %v2797_v53, %v1940_v63  ;;  %v2411_v38 = vpop.f32.mrb[22].mxu1 }
 0x8e5   : > { %v1963_v51 = vsel %vm644_vm0, %v1959_v12, 0.0  ;;  %v1955_v5 = vadd.f32 %v2411_v38, %v3028_v35  ;;  %v1949_v13 = vpop.f32.mrb[23].mxu1 }
 0x8e6   : > { %v1962_v45 = vsel %vm644_vm0, %v1958_v22, 0.0  ;;  %v1950_v46 = vadd.f32 %v1949_v13, %v3020_v26 }
 0x8e7   : > { %v1964_v49 = vadd.f32 %v1963_v51, %v1962_v45  ;;  %v1961_v14 = vadd.f32 %v2818_v62, %v1955_v5 }
 0x8e8   : > { %v1960_v15 = vadd.f32 %v2815_v61, %v1950_v46 }
 0x8e9   : > { %v1967_v53 = vsel %vm644_vm0, %v1961_v14, 0.0 }
 0x8ea   : > { %v1965_v40 = vsel %vm644_vm0, %v1960_v15, 0.0 }
 0x8eb   : > { %v1966_v54 = vadd.f32 %v1965_v40, %v1964_v49 }
 0x8ed   : > { %v1968_v9 = vadd.f32 %v1967_v53, %v1966_v54 }
 0x8ef   : > { %v1969_v50 = vrot.slane %v1968_v9, 4 }
 0x8f1   : > { %v1970_v31 = vadd.f32 %v1969_v50, %v1968_v9 }
 0x8f3   : > { %v1971_v32 = vrot.slane %v1970_v31, 2 }
 0x8f5   : > { %v1972_v35 = vadd.f32 %v1971_v32, %v1970_v31 }
 0x8f7   : > { %v1973_v19 = vrot.slane %v1972_v35, 1 }
 0x8f9   : > { %v1974_v56 = vadd.f32 %v1973_v19, %v1972_v35 }
 0x8fb   : > { %v1975_v57 = vmul.f32 0.03125, %v1974_v56 }
 0x8fd   : > { %v1976_v59 = vsub.f32 %v1958_v22, %v1975_v57  ;;  %v1977_v26 = vsub.f32 %v1959_v12, %v1975_v57  ;;  %v1978_v28 = vsub.f32 %v1960_v15, %v1975_v57  ;;  %v1979_v29 = vsub.f32 %v1961_v14, %v1975_v57 }
 0x8ff   : > { %v1980_v62 = vmul.f32 %v1976_v59, %v1976_v59  ;;  %v1981_v30 = vmul.f32 %v1977_v26, %v1977_v26  ;;  %v1982_v61 = vmul.f32 %v1978_v28, %v1978_v28  ;;  %v1983_v39 = vmul.f32 %v1979_v29, %v1979_v29 }
 0x901   : > { %v1984_v60 = vsel %vm644_vm0, %v1980_v62, 0.0  ;;  %v1985_v3 = vsel %vm644_vm0, %v1981_v30, 0.0  ;;  %v1987_v58 = vsel %vm644_vm0, %v1982_v61, 0.0  ;;  %v1989_v7 = vsel %vm644_vm0, %v1983_v39, 0.0 }
 0x902   : > { %v1986_v52 = vadd.f32 %v1985_v3, %v1984_v60 }
 0x904   : > { %v1988_v4 = vadd.f32 %v1987_v58, %v1986_v52 }
 0x906   : > { %v1990_v17 = vadd.f32 %v1989_v7, %v1988_v4 }
 0x908   : > { %v1991_v48 = vrot.slane %v1990_v17, 4 }
 0x90a   : > { %v1992_v43 = vadd.f32 %v1991_v48, %v1990_v17 }
 0x90c   : > { %v1993_v1 = vrot.slane %v1992_v43, 2 }
 0x90e   : > { %v1994_v44 = vadd.f32 %v1993_v1, %v1992_v43 }
 0x910   : > { %v1995_v41 = vrot.slane %v1994_v44, 1 }
 0x912   : > { %v1996_v20 = vadd.f32 %v1995_v41, %v1994_v44 }
 0x914   : > { %v1997_v33 = vmul.f32 0.03125, %v1996_v20 }
 0x916   : > { %v1998_v27 = vadd.f32 1e-05, %v1997_v33 }
 0x918   : > { %2545 = vrsqrt.f32 %v1998_v27 }
 0x922   : > { %v2546_v47 = vpop.eup %2545 }
 0x923   : > { %v2000_v23 = vmul.f32 %v2546_v47, %v1976_v59  ;;  %v2001_v34 = vmul.f32 %v2546_v47, %v1977_v26  ;;  %v2002_v21 = vmul.f32 %v2546_v47, %v1978_v28  ;;  %v2003_v16 = vmul.f32 %v2546_v47, %v1979_v29 }
 0x925   : > { %v2004_v37 = vmul.f32 %v2000_v23, %v3054_v6  ;;  %v2005_v10 = vmul.f32 %v2001_v34, %v3052_v2  ;;  %v2006_v25 = vmul.f32 %v2002_v21, %v3058_v36  ;;  %v2007_v24 = vmul.f32 %v2003_v16, %v3056_v55 }
 0x927   : > { %v2008_v11 = vadd.f32 %v2004_v37, %v3062_v8  ;;  %v2009_v63 = vadd.f32 %v2005_v10, %v3060_v0  ;;  %v2010_v12 = vadd.f32 %v2006_v25, %v3077_v18  ;;  %v2011_v22 = vadd.f32 %v2007_v24, %v3075_v42 }
 0x929   : > { %2163 = vst.msk [vmem:[%s3073_s24 + $0x20] sm:$0xff] %vm644_vm0, %v2008_v11  ;;  %2164 = vst.msk [vmem:[%s3073_s24 + $0x28] sm:$0xff] %vm644_vm0, %v2009_v63 }
 0x92a   : > { %2165 = vst.msk [vmem:[%s3073_s24 + $0x30] sm:$0xff] %vm644_vm0, %v2010_v12  ;;  %2166 = vst.msk [vmem:[%s3073_s24 + $0x38] sm:$0xff] %vm644_vm0, %v2011_v22 }
 0x92b PF: > { %s23_s25 = sadd.s32 1, %s2553_s25  }
 0x92c   : > { %p20_p4 = scmp.ge.s32.totalorder %s23_s25, 4  }
 0x92e   :  { %22 = sbr.rel (!%p20_p4) target bundleno = 1 (0x1), region = 108 }

</bundles_post_ra>
